<compile_context>
chip_gen: v6e
topology: v6e:2x2x1
jax: 0.10.0
libtpu: 0.0.40
codegen_flags: <defaults>
</compile_context>

<pallas_src>
import functools

import jax
import jax.numpy as jnp
from jax.experimental import pallas as pl
from jax.experimental.pallas import tpu as pltpu


def _round_up(x, m):
    return (x + m - 1) // m * m


# ---------------------------------------------------------------------------
# Stage 1 kernel: LN -> conv1 (two matmuls) -> GLU -> depthwise conv,
#                 plus per-tile partial sums for the BatchNorm statistics.
# ---------------------------------------------------------------------------
def _stage1_kernel(x_ref, ln_g_ref, ln_b_ref, wa_ref, wb_ref, wd_ref,
                   u_ref, psum_ref, psq_ref, *, T, D, K):
    Tp = x_ref.shape[1]
    Dp = x_ref.shape[2]
    Cp = wa_ref.shape[1]
    pad = (K - 1) // 2
    eps = 1e-5

    x = x_ref[0].astype(jnp.float32)                        # (Tp, Dp)

    # ---- LayerNorm over the first D (real) features; padded lanes are 0. ----
    lane = jax.lax.broadcasted_iota(jnp.int32, (Tp, Dp), 1)
    fmask = lane < D
    inv_d = 1.0 / D
    mu = jnp.sum(x, axis=-1, keepdims=True) * inv_d          # padded lanes = 0
    xc = jnp.where(fmask, x - mu, 0.0)
    var = jnp.sum(xc * xc, axis=-1, keepdims=True) * inv_d
    xn = xc * jax.lax.rsqrt(var + eps)
    xn = xn * ln_g_ref[0] + ln_b_ref[0]     # padded gamma/beta = 0 -> xn padded = 0

    # ---- conv1 split into two lane-dense bf16 matmuls + GLU (pure VPU). ----
    xn16 = xn.astype(jnp.bfloat16)
    a = jnp.dot(xn16, wa_ref[...], preferred_element_type=jnp.float32)
    b = jnp.dot(xn16, wb_ref[...], preferred_element_type=jnp.float32)
    g = a * jax.nn.sigmoid(b)                                # (Tp, Cp)

    # Zero padded time rows so they behave exactly like SAME-padding zeros.
    tidx = jax.lax.broadcasted_iota(jnp.int32, (Tp, Cp), 0)
    tmask = tidx < T
    g = jnp.where(tmask, g, 0.0)

    # ---- depthwise conv over time: XLU rolls + boundary masks (no padded
    #      temporary, no sublane-misaligned slices). ----
    u = jnp.zeros((Tp, Cp), jnp.float32)
    for k in range(K):                                       # static unroll, K small
        rolled = pltpu.roll(g, shift=(pad - k) % Tp, axis=0)
        src = tidx - pad + k
        valid = (src >= 0) & (src < T)
        u = u + jnp.where(valid, rolled, 0.0) * wd_ref[k]

    u_ref[0] = u.astype(u_ref.dtype)

    # ---- per-tile partial sums for BatchNorm stats (valid time rows only). ----
    uv = jnp.where(tmask, u, 0.0)
    psum_ref[...] = jnp.sum(uv, axis=0, keepdims=True)[None]        # (1, 1, Cp)
    psq_ref[...] = jnp.sum(uv * uv, axis=0, keepdims=True)[None]    # (1, 1, Cp)


# ---------------------------------------------------------------------------
# Stage 2 kernel: BatchNorm (folded scale/shift) -> SiLU -> conv3.
# ---------------------------------------------------------------------------
def _stage2_kernel(u_ref, scale_ref, shift_ref, w3_ref, o_ref):
    u = u_ref[0].astype(jnp.float32)                         # (Tp, Cp)
    h = u * scale_ref[0] + shift_ref[0]                      # BatchNorm affine
    h = h * jax.nn.sigmoid(h)                                # SiLU (f32 VPU)
    out = jnp.dot(h.astype(jnp.bfloat16), w3_ref[...],
                  preferred_element_type=jnp.float32)        # (Tp, Dp) lane-dense
    # Dropout(p=0.0) is the identity.
    o_ref[0] = out.astype(o_ref.dtype)


@jax.jit
def conv_module_forward(x, ln_g, ln_b, w1, wd, w3, bn_w, bn_b):
    """Fused forward of the Conformer convolution module (active width).

    x:    (B, T, D) float32   input (channels-last)
    ln_g: (D,), ln_b: (D,)    LayerNorm affine
    w1:   (2C, D)             conv1 pointwise weight (out, in)
    wd:   (C, K)              depthwise conv weight (out, tap)
    w3:   (D, C)              conv3 pointwise weight (out, in)
    bn_w: (C,), bn_b: (C,)    BatchNorm affine
    """
    eps = 1e-5
    B, T, D = x.shape
    C = w1.shape[0] // 2
    K = wd.shape[1]

    Dp = _round_up(D, 128)
    Cp = _round_up(C, 128)
    Tp = _round_up(T, 8)

    f32, bf16 = jnp.float32, jnp.bfloat16

    # ---- lane-dense (zero-padded) layouts; exact (zeros do not change math). ----
    xp = jnp.zeros((B, Tp, Dp), f32).at[:, :T, :D].set(x.astype(f32))
    ln_g_p = jnp.zeros((1, Dp), f32).at[0, :D].set(ln_g)
    ln_b_p = jnp.zeros((1, Dp), f32).at[0, :D].set(ln_b)
    wa = jnp.zeros((Dp, Cp), bf16).at[:D, :C].set(w1[:C].T.astype(bf16))
    wb = jnp.zeros((Dp, Cp), bf16).at[:D, :C].set(w1[C:].T.astype(bf16))
    wd_p = jnp.zeros((K, Cp), f32).at[:, :C].set(wd.T)
    w3_p = jnp.zeros((Cp, Dp), bf16).at[:C, :D].set(w3.T.astype(bf16))
    bn_w_p = jnp.zeros((Cp,), f32).at[:C].set(bn_w)
    bn_b_p = jnp.zeros((Cp,), f32).at[:C].set(bn_b)

    cparams = pltpu.CompilerParams(
        dimension_semantics=("parallel",),        # shard grid across TCs on v7x
        vmem_limit_bytes=32 * 1024 * 1024,        # explicit, v7x-safe (<64 MiB)
    )

    # ---- stage 1: LN -> conv1 -> GLU -> depthwise, plus BN partial stats ----
    stage1 = pl.pallas_call(
        functools.partial(_stage1_kernel, T=T, D=D, K=K),
        grid_spec=pltpu.PrefetchScalarGridSpec(
            num_scalar_prefetch=0,
            grid=(B,),
            in_specs=[
                pl.BlockSpec((1, Tp, Dp), lambda b: (b, 0, 0)),   # x tile
                pl.BlockSpec((1, Dp), lambda b: (0, 0)),          # ln gamma (resident)
                pl.BlockSpec((1, Dp), lambda b: (0, 0)),          # ln beta
                pl.BlockSpec((Dp, Cp), lambda b: (0, 0)),         # conv1 "a" half
                pl.BlockSpec((Dp, Cp), lambda b: (0, 0)),         # conv1 "b" half
                pl.BlockSpec((K, Cp), lambda b: (0, 0)),          # depthwise taps
            ],
            out_specs=[
                pl.BlockSpec((1, Tp, Cp), lambda b: (b, 0, 0)),   # depthwise output
                pl.BlockSpec((1, 1, Cp), lambda b: (b, 0, 0)),    # partial sum
                pl.BlockSpec((1, 1, Cp), lambda b: (b, 0, 0)),    # partial sumsq
            ],
        ),
        out_shape=(
            jax.ShapeDtypeStruct((B, Tp, Cp), f32),
            jax.ShapeDtypeStruct((B, 1, Cp), f32),
            jax.ShapeDtypeStruct((B, 1, Cp), f32),
        ),
        compiler_params=cparams,
        cost_estimate=pl.CostEstimate(
            flops=4 * B * Tp * Dp * Cp + 2 * B * Tp * Cp * K,
            transcendentals=B * Tp * Cp,
            bytes_accessed=4 * B * Tp * (Dp + Cp) + 4 * Dp * Cp,
        ),
    )
    u, psum, psq = stage1(xp, ln_g_p, ln_b_p, wa, wb, wd_p)

    # ---- BatchNorm1d batch statistics (training mode, biased variance),
    #      reduced across tiles outside the grid and folded into scale/shift. ----
    n = float(B * T)
    mean = jnp.sum(psum[:, 0, :], axis=0) / n                 # (Cp,)
    msq = jnp.sum(psq[:, 0, :], axis=0) / n
    var = jnp.maximum(msq - mean * mean, 0.0)
    inv = jax.lax.rsqrt(var + eps)
    scale = (bn_w_p * inv).reshape(1, Cp)
    shift = (bn_b_p - mean * bn_w_p * inv).reshape(1, Cp)
    # TODO(synk): BatchNorm1d running-mean/var buffer updates (training side
    # effect) are not materialized; only the normalization math is reproduced.

    # ---- stage 2: BN affine -> SiLU -> conv3 (pointwise) ----
    stage2 = pl.pallas_call(
        _stage2_kernel,
        grid_spec=pltpu.PrefetchScalarGridSpec(
            num_scalar_prefetch=0,
            grid=(B,),
            in_specs=[
                pl.BlockSpec((1, Tp, Cp), lambda b: (b, 0, 0)),   # depthwise output
                pl.BlockSpec((1, Cp), lambda b: (0, 0)),          # BN scale (resident)
                pl.BlockSpec((1, Cp), lambda b: (0, 0)),          # BN shift
                pl.BlockSpec((Cp, Dp), lambda b: (0, 0)),         # conv3 weight
            ],
            out_specs=pl.BlockSpec((1, Tp, Dp), lambda b: (b, 0, 0)),
        ),
        out_shape=jax.ShapeDtypeStruct((B, Tp, Dp), f32),
        compiler_params=cparams,
        cost_estimate=pl.CostEstimate(
            flops=2 * B * Tp * Cp * Dp,
            transcendentals=B * Tp * Cp,
            bytes_accessed=4 * B * Tp * (Cp + Dp) + 2 * Cp * Dp,
        ),
    )
    out_p = stage2(u, scale, shift, w3_p)

    return out_p[:, :T, :D]


def reference_forward(x, ln_g, ln_b, w1, wd, w3, bn_w, bn_b):
    """Pure-JAX (f32) reference of the same math, for correctness checking."""
    eps = 1e-5
    B, T, D = x.shape
    C, K = wd.shape
    pad = (K - 1) // 2
    mu = jnp.mean(x, -1, keepdims=True)
    var = jnp.mean((x - mu) ** 2, -1, keepdims=True)
    xn = (x - mu) / jnp.sqrt(var + eps) * ln_g + ln_b
    y = jnp.einsum("btd,cd->btc", xn, w1)                     # (B, T, 2C)
    g = y[..., :C] * jax.nn.sigmoid(y[..., C:])
    gp = jnp.pad(g, ((0, 0), (pad, pad), (0, 0)))
    u = sum(gp[:, k:k + T, :] * wd[:, k] for k in range(K))
    m = jnp.mean(u, axis=(0, 1), keepdims=True)
    v = jnp.mean((u - m) ** 2, axis=(0, 1), keepdims=True)
    h = (u - m) / jnp.sqrt(v + eps) * bn_w + bn_b
    h = h * jax.nn.sigmoid(h)
    return jnp.einsum("btc,dc->btd", h, w3)


if __name__ == "__main__":
    # Module hyper-parameters (small, consistent with the PyTorch module).
    input_dim = 32
    num_channels = 16
    depthwise_kernel_size = 7
    switches = [0.75, 1]
    idx = 0                                   # exercise the "slimmed" width
    B, T = 2, 16

    D = int(switches[idx] * input_dim)        # active feature dim  (24)
    C = int(switches[idx] * num_channels)     # active channel dim  (12)
    K = depthwise_kernel_size

    key = jax.random.PRNGKey(0)
    k_x, k_lg, k_lb, k_w1, k_wd, k_w3, k_bw, k_bb = jax.random.split(key, 8)

    # Full-width parameters (as __init__ would allocate).
    ln_g_full = 1.0 + 0.1 * jax.random.normal(k_lg, (input_dim,), jnp.float32)
    ln_b_full = 0.1 * jax.random.normal(k_lb, (input_dim,), jnp.float32)
    w1_full = 0.1 * jax.random.normal(k_w1, (2 * num_channels, input_dim), jnp.float32)
    wd_full = 0.1 * jax.random.normal(k_wd, (num_channels, K), jnp.float32)
    w3_full = 0.1 * jax.random.normal(k_w3, (input_dim, num_channels), jnp.float32)
    bn_w_full = 1.0 + 0.1 * jax.random.normal(k_bw, (num_channels,), jnp.float32)
    bn_b_full = 0.1 * jax.random.normal(k_bb, (num_channels,), jnp.float32)

    # Slimmable slicing at the active width (idx), natural PyTorch layouts.
    ln_g = ln_g_full[:D]
    ln_b = ln_b_full[:D]
    w1 = w1_full[:2 * C, :D]      # conv1 weight (out=2C, in=D)
    wd = wd_full[:C, :]           # depthwise weight (out=C, taps=K)
    w3 = w3_full[:D, :C]          # conv3 weight (out=D, in=C)
    bn_w = bn_w_full[:C]
    bn_b = bn_b_full[:C]

    x = jax.random.normal(k_x, (B, T, D), jnp.float32)

    out = conv_module_forward(x, ln_g, ln_b, w1, wd, w3, bn_w, bn_b)
    out = jax.block_until_ready(out)

    ref = reference_forward(x, ln_g, ln_b, w1, wd, w3, bn_w, bn_b)
    assert out.shape == (B, T, D)
    err = float(jnp.max(jnp.abs(out - ref)))
    # bf16 MXU operands with f32 accumulation -> loosened tolerance.
    assert err < 3e-2, f"mismatch vs reference: max abs err = {err}"

    print("KERNEL_OK")
</pallas_src>

<mosaic_0001>
module attributes {stable_mosaic.version = 11 : i64} {
  func.func @_stage1_kernel(%arg0: i32, %arg1: memref<1x16x128xf32, #tpu.memory_space<vmem>>, %arg2: memref<1x128xf32, #tpu.memory_space<vmem>>, %arg3: memref<1x128xf32, #tpu.memory_space<vmem>>, %arg4: memref<128x128xbf16, #tpu.memory_space<vmem>>, %arg5: memref<128x128xbf16, #tpu.memory_space<vmem>>, %arg6: memref<7x128xf32, #tpu.memory_space<vmem>>, %arg7: memref<1x16x128xf32, #tpu.memory_space<vmem>>, %arg8: memref<1x1x128xf32, #tpu.memory_space<vmem>>, %arg9: memref<1x1x128xf32, #tpu.memory_space<vmem>>) attributes {dimension_semantics = [#tpu.dimension_semantics<parallel>], iteration_bounds = array<i64: 2>, scalar_prefetch = 0 : i64, scratch_operands = 0 : i64, tpu.core_type = #tpu.core_type<tc>, window_params = [{transform_indices = @transform_0, window_bounds = array<i64: 1, 16, 128>}, {pipeline_mode = #tpu.pipeline_mode<synchronous>, transform_indices = @transform_1, window_bounds = array<i64: 1, 128>}, {pipeline_mode = #tpu.pipeline_mode<synchronous>, transform_indices = @transform_2, window_bounds = array<i64: 1, 128>}, {pipeline_mode = #tpu.pipeline_mode<synchronous>, transform_indices = @transform_3, window_bounds = array<i64: 128, 128>}, {pipeline_mode = #tpu.pipeline_mode<synchronous>, transform_indices = @transform_4, window_bounds = array<i64: 128, 128>}, {pipeline_mode = #tpu.pipeline_mode<synchronous>, transform_indices = @transform_5, window_bounds = array<i64: 7, 128>}, {transform_indices = @transform_6, window_bounds = array<i64: 1, 16, 128>}, {transform_indices = @transform_7, window_bounds = array<i64: 1, 1, 128>}, {transform_indices = @transform_8, window_bounds = array<i64: 1, 1, 128>}]} {
    %c0 = arith.constant 0 : index
    %c0_0 = arith.constant 0 : index
    %c0_1 = arith.constant 0 : index
    %0 = vector.load %arg1[%c0, %c0_0, %c0_1] : memref<1x16x128xf32, #tpu.memory_space<vmem>>, vector<1x16x128xf32>
    %1 = vector.shape_cast %0 : vector<1x16x128xf32> to vector<16x128xf32>
    %2 = tpu.iota {dimensions = array<i32: 1>} : vector<16x128xi32>
    %c24_i32 = arith.constant 24 : i32
    %3 = vector.broadcast %c24_i32 : i32 to vector<16x128xi32>
    %4 = arith.cmpi slt, %2, %3 : vector<16x128xi32>
    %cst = arith.constant dense<0.000000e+00> : vector<16xf32>
    %5 = vector.multi_reduction <add>, %1, %cst [1] : vector<16x128xf32> to vector<16xf32>
    %6 = vector.shape_cast %5 : vector<16xf32> to vector<16x1xf32>
    %cst_2 = arith.constant 0.0416666679 : f32
    %7 = vector.broadcast %cst_2 : f32 to vector<16x1xf32>
    %8 = arith.mulf %6, %7 : vector<16x1xf32>
    %9 = vector.broadcast %8 : vector<16x1xf32> to vector<16x128xf32>
    %10 = arith.subf %1, %9 : vector<16x128xf32>
    %cst_3 = arith.constant 0.000000e+00 : f32
    %11 = vector.broadcast %cst_3 : f32 to vector<16x128xf32>
    %12 = arith.select %4, %10, %11 : vector<16x128xi1>, vector<16x128xf32>
    %13 = arith.mulf %12, %12 : vector<16x128xf32>
    %cst_4 = arith.constant dense<0.000000e+00> : vector<16xf32>
    %14 = vector.multi_reduction <add>, %13, %cst_4 [1] : vector<16x128xf32> to vector<16xf32>
    %15 = vector.shape_cast %14 : vector<16xf32> to vector<16x1xf32>
    %cst_5 = arith.constant 0.0416666679 : f32
    %16 = vector.broadcast %cst_5 : f32 to vector<16x1xf32>
    %17 = arith.mulf %15, %16 : vector<16x1xf32>
    %cst_6 = arith.constant 9.99999974E-6 : f32
    %18 = vector.broadcast %cst_6 : f32 to vector<16x1xf32>
    %19 = arith.addf %17, %18 : vector<16x1xf32>
    %20 = math.rsqrt %19 : vector<16x1xf32>
    %21 = vector.broadcast %20 : vector<16x1xf32> to vector<16x128xf32>
    %22 = arith.mulf %12, %21 : vector<16x128xf32>
    %c0_7 = arith.constant 0 : index
    %c0_8 = arith.constant 0 : index
    %23 = vector.load %arg2[%c0_7, %c0_8] : memref<1x128xf32, #tpu.memory_space<vmem>>, vector<1x128xf32>
    %24 = vector.shape_cast %23 : vector<1x128xf32> to vector<128xf32>
    %25 = vector.shape_cast %24 : vector<128xf32> to vector<1x128xf32>
    %26 = vector.broadcast %25 : vector<1x128xf32> to vector<16x128xf32>
    %27 = arith.mulf %22, %26 : vector<16x128xf32>
    %c0_9 = arith.constant 0 : index
    %c0_10 = arith.constant 0 : index
    %28 = vector.load %arg3[%c0_9, %c0_10] : memref<1x128xf32, #tpu.memory_space<vmem>>, vector<1x128xf32>
    %29 = vector.shape_cast %28 : vector<1x128xf32> to vector<128xf32>
    %30 = vector.shape_cast %29 : vector<128xf32> to vector<1x128xf32>
    %31 = vector.broadcast %30 : vector<1x128xf32> to vector<16x128xf32>
    %32 = arith.addf %27, %31 : vector<16x128xf32>
    %33 = arith.truncf %32 : vector<16x128xf32> to vector<16x128xbf16>
    %c0_11 = arith.constant 0 : index
    %c0_12 = arith.constant 0 : index
    %34 = vector.load %arg4[%c0_11, %c0_12] : memref<128x128xbf16, #tpu.memory_space<vmem>>, vector<128x128xbf16>
    %cst_13 = arith.constant dense<0.000000e+00> : vector<16x128xf32>
    %35 = tpu.matmul %33, %34, %cst_13 {dimension_numbers = #tpu.dot_dimension_numbers<[1], [0], [0], [1], [0, 0, 1, 1], [], []>} : vector<16x128xbf16>, vector<128x128xbf16>, vector<16x128xf32> -> vector<16x128xf32>
    %c0_14 = arith.constant 0 : index
    %c0_15 = arith.constant 0 : index
    %36 = vector.load %arg5[%c0_14, %c0_15] : memref<128x128xbf16, #tpu.memory_space<vmem>>, vector<128x128xbf16>
    %cst_16 = arith.constant dense<0.000000e+00> : vector<16x128xf32>
    %37 = tpu.matmul %33, %36, %cst_16 {dimension_numbers = #tpu.dot_dimension_numbers<[1], [0], [0], [1], [0, 0, 1, 1], [], []>} : vector<16x128xbf16>, vector<128x128xbf16>, vector<16x128xf32> -> vector<16x128xf32>
    %38 = arith.negf %37 : vector<16x128xf32>
    %39 = math.exp %38 : vector<16x128xf32>
    %cst_17 = arith.constant 1.000000e+00 : f32
    %40 = vector.broadcast %cst_17 : f32 to vector<16x128xf32>
    %41 = arith.addf %40, %39 : vector<16x128xf32>
    %42 = arith.divf %40, %41 : vector<16x128xf32>
    %43 = arith.mulf %35, %42 : vector<16x128xf32>
    %44 = tpu.iota {dimensions = array<i32: 0>} : vector<16x128xi32>
    %c16_i32 = arith.constant 16 : i32
    %45 = vector.broadcast %c16_i32 : i32 to vector<16x128xi32>
    %46 = arith.cmpi slt, %44, %45 : vector<16x128xi32>
    %cst_18 = arith.constant 0.000000e+00 : f32
    %47 = vector.broadcast %cst_18 : f32 to vector<16x128xf32>
    %48 = arith.select %46, %43, %47 : vector<16x128xi1>, vector<16x128xf32>
    %cst_19 = arith.constant 0.000000e+00 : f32
    %49 = vector.broadcast %cst_19 : f32 to vector<16x128xf32>
    %c3_i32 = arith.constant 3 : i32
    %50 = tpu.dynamic_rotate %48 by %c3_i32 dim 0 : vector<16x128xf32>, i32 -> vector<16x128xf32>
    %c3_i32_20 = arith.constant 3 : i32
    %51 = vector.broadcast %c3_i32_20 : i32 to vector<16x128xi32>
    %52 = arith.subi %44, %51 : vector<16x128xi32>
    %c0_i32 = arith.constant 0 : i32
    %53 = vector.broadcast %c0_i32 : i32 to vector<16x128xi32>
    %54 = arith.addi %52, %53 : vector<16x128xi32>
    %c0_i32_21 = arith.constant 0 : i32
    %55 = vector.broadcast %c0_i32_21 : i32 to vector<16x128xi32>
    %56 = arith.cmpi sge, %54, %55 : vector<16x128xi32>
    %c16_i32_22 = arith.constant 16 : i32
    %57 = vector.broadcast %c16_i32_22 : i32 to vector<16x128xi32>
    %58 = arith.cmpi slt, %54, %57 : vector<16x128xi32>
    %59 = arith.andi %56, %58 : vector<16x128xi1>
    %cst_23 = arith.constant 0.000000e+00 : f32
    %60 = vector.broadcast %cst_23 : f32 to vector<16x128xf32>
    %61 = arith.select %59, %50, %60 : vector<16x128xi1>, vector<16x128xf32>
    %c0_24 = arith.constant 0 : index
    %c0_25 = arith.constant 0 : index
    %62 = vector.load %arg6[%c0_24, %c0_25] : memref<7x128xf32, #tpu.memory_space<vmem>>, vector<1x128xf32>
    %63 = vector.shape_cast %62 : vector<1x128xf32> to vector<128xf32>
    %64 = vector.shape_cast %63 : vector<128xf32> to vector<1x128xf32>
    %65 = vector.broadcast %64 : vector<1x128xf32> to vector<16x128xf32>
    %66 = arith.mulf %61, %65 : vector<16x128xf32>
    %67 = arith.addf %49, %66 : vector<16x128xf32>
    %c2_i32 = arith.constant 2 : i32
    %68 = tpu.dynamic_rotate %48 by %c2_i32 dim 0 : vector<16x128xf32>, i32 -> vector<16x128xf32>
    %c3_i32_26 = arith.constant 3 : i32
    %69 = vector.broadcast %c3_i32_26 : i32 to vector<16x128xi32>
    %70 = arith.subi %44, %69 : vector<16x128xi32>
    %c1_i32 = arith.constant 1 : i32
    %71 = vector.broadcast %c1_i32 : i32 to vector<16x128xi32>
    %72 = arith.addi %70, %71 : vector<16x128xi32>
    %c0_i32_27 = arith.constant 0 : i32
    %73 = vector.broadcast %c0_i32_27 : i32 to vector<16x128xi32>
    %74 = arith.cmpi sge, %72, %73 : vector<16x128xi32>
    %c16_i32_28 = arith.constant 16 : i32
    %75 = vector.broadcast %c16_i32_28 : i32 to vector<16x128xi32>
    %76 = arith.cmpi slt, %72, %75 : vector<16x128xi32>
    %77 = arith.andi %74, %76 : vector<16x128xi1>
    %cst_29 = arith.constant 0.000000e+00 : f32
    %78 = vector.broadcast %cst_29 : f32 to vector<16x128xf32>
    %79 = arith.select %77, %68, %78 : vector<16x128xi1>, vector<16x128xf32>
    %c1 = arith.constant 1 : index
    %c0_30 = arith.constant 0 : index
    %80 = vector.load %arg6[%c1, %c0_30] : memref<7x128xf32, #tpu.memory_space<vmem>>, vector<1x128xf32>
    %81 = vector.shape_cast %80 : vector<1x128xf32> to vector<128xf32>
    %82 = vector.shape_cast %81 : vector<128xf32> to vector<1x128xf32>
    %83 = vector.broadcast %82 : vector<1x128xf32> to vector<16x128xf32>
    %84 = arith.mulf %79, %83 : vector<16x128xf32>
    %85 = arith.addf %67, %84 : vector<16x128xf32>
    %c1_i32_31 = arith.constant 1 : i32
    %86 = tpu.dynamic_rotate %48 by %c1_i32_31 dim 0 : vector<16x128xf32>, i32 -> vector<16x128xf32>
    %c3_i32_32 = arith.constant 3 : i32
    %87 = vector.broadcast %c3_i32_32 : i32 to vector<16x128xi32>
    %88 = arith.subi %44, %87 : vector<16x128xi32>
    %c2_i32_33 = arith.constant 2 : i32
    %89 = vector.broadcast %c2_i32_33 : i32 to vector<16x128xi32>
    %90 = arith.addi %88, %89 : vector<16x128xi32>
    %c0_i32_34 = arith.constant 0 : i32
    %91 = vector.broadcast %c0_i32_34 : i32 to vector<16x128xi32>
    %92 = arith.cmpi sge, %90, %91 : vector<16x128xi32>
    %c16_i32_35 = arith.constant 16 : i32
    %93 = vector.broadcast %c16_i32_35 : i32 to vector<16x128xi32>
    %94 = arith.cmpi slt, %90, %93 : vector<16x128xi32>
    %95 = arith.andi %92, %94 : vector<16x128xi1>
    %cst_36 = arith.constant 0.000000e+00 : f32
    %96 = vector.broadcast %cst_36 : f32 to vector<16x128xf32>
    %97 = arith.select %95, %86, %96 : vector<16x128xi1>, vector<16x128xf32>
    %c2 = arith.constant 2 : index
    %c0_37 = arith.constant 0 : index
    %98 = vector.load %arg6[%c2, %c0_37] : memref<7x128xf32, #tpu.memory_space<vmem>>, vector<1x128xf32>
    %99 = vector.shape_cast %98 : vector<1x128xf32> to vector<128xf32>
    %100 = vector.shape_cast %99 : vector<128xf32> to vector<1x128xf32>
    %101 = vector.broadcast %100 : vector<1x128xf32> to vector<16x128xf32>
    %102 = arith.mulf %97, %101 : vector<16x128xf32>
    %103 = arith.addf %85, %102 : vector<16x128xf32>
    %c0_i32_38 = arith.constant 0 : i32
    %104 = tpu.dynamic_rotate %48 by %c0_i32_38 dim 0 : vector<16x128xf32>, i32 -> vector<16x128xf32>
    %c3_i32_39 = arith.constant 3 : i32
    %105 = vector.broadcast %c3_i32_39 : i32 to vector<16x128xi32>
    %106 = arith.subi %44, %105 : vector<16x128xi32>
    %c3_i32_40 = arith.constant 3 : i32
    %107 = vector.broadcast %c3_i32_40 : i32 to vector<16x128xi32>
    %108 = arith.addi %106, %107 : vector<16x128xi32>
    %c0_i32_41 = arith.constant 0 : i32
    %109 = vector.broadcast %c0_i32_41 : i32 to vector<16x128xi32>
    %110 = arith.cmpi sge, %108, %109 : vector<16x128xi32>
    %c16_i32_42 = arith.constant 16 : i32
    %111 = vector.broadcast %c16_i32_42 : i32 to vector<16x128xi32>
    %112 = arith.cmpi slt, %108, %111 : vector<16x128xi32>
    %113 = arith.andi %110, %112 : vector<16x128xi1>
    %cst_43 = arith.constant 0.000000e+00 : f32
    %114 = vector.broadcast %cst_43 : f32 to vector<16x128xf32>
    %115 = arith.select %113, %104, %114 : vector<16x128xi1>, vector<16x128xf32>
    %c3 = arith.constant 3 : index
    %c0_44 = arith.constant 0 : index
    %116 = vector.load %arg6[%c3, %c0_44] : memref<7x128xf32, #tpu.memory_space<vmem>>, vector<1x128xf32>
    %117 = vector.shape_cast %116 : vector<1x128xf32> to vector<128xf32>
    %118 = vector.shape_cast %117 : vector<128xf32> to vector<1x128xf32>
    %119 = vector.broadcast %118 : vector<1x128xf32> to vector<16x128xf32>
    %120 = arith.mulf %115, %119 : vector<16x128xf32>
    %121 = arith.addf %103, %120 : vector<16x128xf32>
    %c15_i32 = arith.constant 15 : i32
    %122 = tpu.dynamic_rotate %48 by %c15_i32 dim 0 : vector<16x128xf32>, i32 -> vector<16x128xf32>
    %c3_i32_45 = arith.constant 3 : i32
    %123 = vector.broadcast %c3_i32_45 : i32 to vector<16x128xi32>
    %124 = arith.subi %44, %123 : vector<16x128xi32>
    %c4_i32 = arith.constant 4 : i32
    %125 = vector.broadcast %c4_i32 : i32 to vector<16x128xi32>
    %126 = arith.addi %124, %125 : vector<16x128xi32>
    %c0_i32_46 = arith.constant 0 : i32
    %127 = vector.broadcast %c0_i32_46 : i32 to vector<16x128xi32>
    %128 = arith.cmpi sge, %126, %127 : vector<16x128xi32>
    %c16_i32_47 = arith.constant 16 : i32
    %129 = vector.broadcast %c16_i32_47 : i32 to vector<16x128xi32>
    %130 = arith.cmpi slt, %126, %129 : vector<16x128xi32>
    %131 = arith.andi %128, %130 : vector<16x128xi1>
    %cst_48 = arith.constant 0.000000e+00 : f32
    %132 = vector.broadcast %cst_48 : f32 to vector<16x128xf32>
    %133 = arith.select %131, %122, %132 : vector<16x128xi1>, vector<16x128xf32>
    %c4 = arith.constant 4 : index
    %c0_49 = arith.constant 0 : index
    %134 = vector.load %arg6[%c4, %c0_49] : memref<7x128xf32, #tpu.memory_space<vmem>>, vector<1x128xf32>
    %135 = vector.shape_cast %134 : vector<1x128xf32> to vector<128xf32>
    %136 = vector.shape_cast %135 : vector<128xf32> to vector<1x128xf32>
    %137 = vector.broadcast %136 : vector<1x128xf32> to vector<16x128xf32>
    %138 = arith.mulf %133, %137 : vector<16x128xf32>
    %139 = arith.addf %121, %138 : vector<16x128xf32>
    %c14_i32 = arith.constant 14 : i32
    %140 = tpu.dynamic_rotate %48 by %c14_i32 dim 0 : vector<16x128xf32>, i32 -> vector<16x128xf32>
    %c3_i32_50 = arith.constant 3 : i32
    %141 = vector.broadcast %c3_i32_50 : i32 to vector<16x128xi32>
    %142 = arith.subi %44, %141 : vector<16x128xi32>
    %c5_i32 = arith.constant 5 : i32
    %143 = vector.broadcast %c5_i32 : i32 to vector<16x128xi32>
    %144 = arith.addi %142, %143 : vector<16x128xi32>
    %c0_i32_51 = arith.constant 0 : i32
    %145 = vector.broadcast %c0_i32_51 : i32 to vector<16x128xi32>
    %146 = arith.cmpi sge, %144, %145 : vector<16x128xi32>
    %c16_i32_52 = arith.constant 16 : i32
    %147 = vector.broadcast %c16_i32_52 : i32 to vector<16x128xi32>
    %148 = arith.cmpi slt, %144, %147 : vector<16x128xi32>
    %149 = arith.andi %146, %148 : vector<16x128xi1>
    %cst_53 = arith.constant 0.000000e+00 : f32
    %150 = vector.broadcast %cst_53 : f32 to vector<16x128xf32>
    %151 = arith.select %149, %140, %150 : vector<16x128xi1>, vector<16x128xf32>
    %c5 = arith.constant 5 : index
    %c0_54 = arith.constant 0 : index
    %152 = vector.load %arg6[%c5, %c0_54] : memref<7x128xf32, #tpu.memory_space<vmem>>, vector<1x128xf32>
    %153 = vector.shape_cast %152 : vector<1x128xf32> to vector<128xf32>
    %154 = vector.shape_cast %153 : vector<128xf32> to vector<1x128xf32>
    %155 = vector.broadcast %154 : vector<1x128xf32> to vector<16x128xf32>
    %156 = arith.mulf %151, %155 : vector<16x128xf32>
    %157 = arith.addf %139, %156 : vector<16x128xf32>
    %c13_i32 = arith.constant 13 : i32
    %158 = tpu.dynamic_rotate %48 by %c13_i32 dim 0 : vector<16x128xf32>, i32 -> vector<16x128xf32>
    %c3_i32_55 = arith.constant 3 : i32
    %159 = vector.broadcast %c3_i32_55 : i32 to vector<16x128xi32>
    %160 = arith.subi %44, %159 : vector<16x128xi32>
    %c6_i32 = arith.constant 6 : i32
    %161 = vector.broadcast %c6_i32 : i32 to vector<16x128xi32>
    %162 = arith.addi %160, %161 : vector<16x128xi32>
    %c0_i32_56 = arith.constant 0 : i32
    %163 = vector.broadcast %c0_i32_56 : i32 to vector<16x128xi32>
    %164 = arith.cmpi sge, %162, %163 : vector<16x128xi32>
    %c16_i32_57 = arith.constant 16 : i32
    %165 = vector.broadcast %c16_i32_57 : i32 to vector<16x128xi32>
    %166 = arith.cmpi slt, %162, %165 : vector<16x128xi32>
    %167 = arith.andi %164, %166 : vector<16x128xi1>
    %cst_58 = arith.constant 0.000000e+00 : f32
    %168 = vector.broadcast %cst_58 : f32 to vector<16x128xf32>
    %169 = arith.select %167, %158, %168 : vector<16x128xi1>, vector<16x128xf32>
    %c6 = arith.constant 6 : index
    %c0_59 = arith.constant 0 : index
    %170 = vector.load %arg6[%c6, %c0_59] : memref<7x128xf32, #tpu.memory_space<vmem>>, vector<1x128xf32>
    %171 = vector.shape_cast %170 : vector<1x128xf32> to vector<128xf32>
    %172 = vector.shape_cast %171 : vector<128xf32> to vector<1x128xf32>
    %173 = vector.broadcast %172 : vector<1x128xf32> to vector<16x128xf32>
    %174 = arith.mulf %169, %173 : vector<16x128xf32>
    %175 = arith.addf %157, %174 : vector<16x128xf32>
    %c0_60 = arith.constant 0 : index
    %c0_61 = arith.constant 0 : index
    %c0_62 = arith.constant 0 : index
    %176 = vector.load %arg7[%c0_60, %c0_61, %c0_62] : memref<1x16x128xf32, #tpu.memory_space<vmem>>, vector<1x16x128xf32>
    %177 = vector.shape_cast %176 : vector<1x16x128xf32> to vector<16x128xf32>
    %178 = vector.shape_cast %175 : vector<16x128xf32> to vector<1x16x128xf32>
    tpu.vector_store %arg7[%c0_60, %c0_61, %c0_62], %178 {strides = array<i32>} : memref<1x16x128xf32, #tpu.memory_space<vmem>>, vector<1x16x128xf32>,
    %cst_63 = arith.constant 0.000000e+00 : f32
    %179 = vector.broadcast %cst_63 : f32 to vector<16x128xf32>
    %180 = arith.select %46, %175, %179 : vector<16x128xi1>, vector<16x128xf32>
    %cst_64 = arith.constant dense<0.000000e+00> : vector<128xf32>
    %181 = vector.multi_reduction <add>, %180, %cst_64 [0] : vector<16x128xf32> to vector<128xf32>
    %182 = vector.shape_cast %181 : vector<128xf32> to vector<1x128xf32>
    %183 = vector.shape_cast %182 : vector<1x128xf32> to vector<1x1x128xf32>
    %c0_65 = arith.constant 0 : index
    %c0_66 = arith.constant 0 : index
    %c0_67 = arith.constant 0 : index
    %184 = vector.load %arg8[%c0_65, %c0_66, %c0_67] : memref<1x1x128xf32, #tpu.memory_space<vmem>>, vector<1x1x128xf32>
    tpu.vector_store %arg8[%c0_65, %c0_66, %c0_67], %183 {strides = array<i32>} : memref<1x1x128xf32, #tpu.memory_space<vmem>>, vector<1x1x128xf32>,
    %185 = arith.mulf %180, %180 : vector<16x128xf32>
    %cst_68 = arith.constant dense<0.000000e+00> : vector<128xf32>
    %186 = vector.multi_reduction <add>, %185, %cst_68 [0] : vector<16x128xf32> to vector<128xf32>
    %187 = vector.shape_cast %186 : vector<128xf32> to vector<1x128xf32>
    %188 = vector.shape_cast %187 : vector<1x128xf32> to vector<1x1x128xf32>
    %c0_69 = arith.constant 0 : index
    %c0_70 = arith.constant 0 : index
    %c0_71 = arith.constant 0 : index
    %189 = vector.load %arg9[%c0_69, %c0_70, %c0_71] : memref<1x1x128xf32, #tpu.memory_space<vmem>>, vector<1x1x128xf32>
    tpu.vector_store %arg9[%c0_69, %c0_70, %c0_71], %188 {strides = array<i32>} : memref<1x1x128xf32, #tpu.memory_space<vmem>>, vector<1x1x128xf32>,
    return
  }
  func.func @transform_0(%arg0: i32) -> (i32, i32, i32) {
    %c0_i32 = arith.constant 0 : i32
    %c0_i32_0 = arith.constant 0 : i32
    %c0_i32_1 = arith.constant 0 : i32
    return %arg0, %c0_i32, %c0_i32_0 : i32, i32, i32
  }
  func.func @transform_1(%arg0: i32) -> (i32, i32) {
    %c0_i32 = arith.constant 0 : i32
    %c0_i32_0 = arith.constant 0 : i32
    %c0_i32_1 = arith.constant 0 : i32
    return %c0_i32, %c0_i32_0 : i32, i32
  }
  func.func @transform_2(%arg0: i32) -> (i32, i32) {
    %c0_i32 = arith.constant 0 : i32
    %c0_i32_0 = arith.constant 0 : i32
    %c0_i32_1 = arith.constant 0 : i32
    return %c0_i32, %c0_i32_0 : i32, i32
  }
  func.func @transform_3(%arg0: i32) -> (i32, i32) {
    %c0_i32 = arith.constant 0 : i32
    %c0_i32_0 = arith.constant 0 : i32
    %c0_i32_1 = arith.constant 0 : i32
    return %c0_i32, %c0_i32_0 : i32, i32
  }
  func.func @transform_4(%arg0: i32) -> (i32, i32) {
    %c0_i32 = arith.constant 0 : i32
    %c0_i32_0 = arith.constant 0 : i32
    %c0_i32_1 = arith.constant 0 : i32
    return %c0_i32, %c0_i32_0 : i32, i32
  }
  func.func @transform_5(%arg0: i32) -> (i32, i32) {
    %c0_i32 = arith.constant 0 : i32
    %c0_i32_0 = arith.constant 0 : i32
    %c0_i32_1 = arith.constant 0 : i32
    return %c0_i32, %c0_i32_0 : i32, i32
  }
  func.func @transform_6(%arg0: i32) -> (i32, i32, i32) {
    %c0_i32 = arith.constant 0 : i32
    %c0_i32_0 = arith.constant 0 : i32
    %c0_i32_1 = arith.constant 0 : i32
    return %arg0, %c0_i32, %c0_i32_0 : i32, i32, i32
  }
  func.func @transform_7(%arg0: i32) -> (i32, i32, i32) {
    %c0_i32 = arith.constant 0 : i32
    %c0_i32_0 = arith.constant 0 : i32
    %c0_i32_1 = arith.constant 0 : i32
    return %arg0, %c0_i32, %c0_i32_0 : i32, i32, i32
  }
  func.func @transform_8(%arg0: i32) -> (i32, i32, i32) {
    %c0_i32 = arith.constant 0 : i32
    %c0_i32_0 = arith.constant 0 : i32
    %c0_i32_1 = arith.constant 0 : i32
    return %arg0, %c0_i32, %c0_i32_0 : i32, i32, i32
  }
}

module attributes {stable_mosaic.version = 11 : i64} {
  func.func @_stage2_kernel(%arg0: i32, %arg1: memref<1x16x128xf32, #tpu.memory_space<vmem>>, %arg2: memref<1x128xf32, #tpu.memory_space<vmem>>, %arg3: memref<1x128xf32, #tpu.memory_space<vmem>>, %arg4: memref<128x128xbf16, #tpu.memory_space<vmem>>, %arg5: memref<1x16x128xf32, #tpu.memory_space<vmem>>) attributes {dimension_semantics = [#tpu.dimension_semantics<parallel>], iteration_bounds = array<i64: 2>, scalar_prefetch = 0 : i64, scratch_operands = 0 : i64, tpu.core_type = #tpu.core_type<tc>, window_params = [{transform_indices = @transform_0, window_bounds = array<i64: 1, 16, 128>}, {pipeline_mode = #tpu.pipeline_mode<synchronous>, transform_indices = @transform_1, window_bounds = array<i64: 1, 128>}, {pipeline_mode = #tpu.pipeline_mode<synchronous>, transform_indices = @transform_2, window_bounds = array<i64: 1, 128>}, {pipeline_mode = #tpu.pipeline_mode<synchronous>, transform_indices = @transform_3, window_bounds = array<i64: 128, 128>}, {transform_indices = @transform_4, window_bounds = array<i64: 1, 16, 128>}]} {
    %c0 = arith.constant 0 : index
    %c0_0 = arith.constant 0 : index
    %c0_1 = arith.constant 0 : index
    %0 = vector.load %arg1[%c0, %c0_0, %c0_1] : memref<1x16x128xf32, #tpu.memory_space<vmem>>, vector<1x16x128xf32>
    %1 = vector.shape_cast %0 : vector<1x16x128xf32> to vector<16x128xf32>
    %c0_2 = arith.constant 0 : index
    %c0_3 = arith.constant 0 : index
    %2 = vector.load %arg2[%c0_2, %c0_3] : memref<1x128xf32, #tpu.memory_space<vmem>>, vector<1x128xf32>
    %3 = vector.shape_cast %2 : vector<1x128xf32> to vector<128xf32>
    %4 = vector.shape_cast %3 : vector<128xf32> to vector<1x128xf32>
    %5 = vector.broadcast %4 : vector<1x128xf32> to vector<16x128xf32>
    %6 = arith.mulf %1, %5 : vector<16x128xf32>
    %c0_4 = arith.constant 0 : index
    %c0_5 = arith.constant 0 : index
    %7 = vector.load %arg3[%c0_4, %c0_5] : memref<1x128xf32, #tpu.memory_space<vmem>>, vector<1x128xf32>
    %8 = vector.shape_cast %7 : vector<1x128xf32> to vector<128xf32>
    %9 = vector.shape_cast %8 : vector<128xf32> to vector<1x128xf32>
    %10 = vector.broadcast %9 : vector<1x128xf32> to vector<16x128xf32>
    %11 = arith.addf %6, %10 : vector<16x128xf32>
    %12 = arith.negf %11 : vector<16x128xf32>
    %13 = math.exp %12 : vector<16x128xf32>
    %cst = arith.constant 1.000000e+00 : f32
    %14 = vector.broadcast %cst : f32 to vector<16x128xf32>
    %15 = arith.addf %14, %13 : vector<16x128xf32>
    %16 = arith.divf %14, %15 : vector<16x128xf32>
    %17 = arith.mulf %11, %16 : vector<16x128xf32>
    %18 = arith.truncf %17 : vector<16x128xf32> to vector<16x128xbf16>
    %c0_6 = arith.constant 0 : index
    %c0_7 = arith.constant 0 : index
    %19 = vector.load %arg4[%c0_6, %c0_7] : memref<128x128xbf16, #tpu.memory_space<vmem>>, vector<128x128xbf16>
    %cst_8 = arith.constant dense<0.000000e+00> : vector<16x128xf32>
    %20 = tpu.matmul %18, %19, %cst_8 {dimension_numbers = #tpu.dot_dimension_numbers<[1], [0], [0], [1], [0, 0, 1, 1], [], []>} : vector<16x128xbf16>, vector<128x128xbf16>, vector<16x128xf32> -> vector<16x128xf32>
    %c0_9 = arith.constant 0 : index
    %c0_10 = arith.constant 0 : index
    %c0_11 = arith.constant 0 : index
    %21 = vector.load %arg5[%c0_9, %c0_10, %c0_11] : memref<1x16x128xf32, #tpu.memory_space<vmem>>, vector<1x16x128xf32>
    %22 = vector.shape_cast %21 : vector<1x16x128xf32> to vector<16x128xf32>
    %23 = vector.shape_cast %20 : vector<16x128xf32> to vector<1x16x128xf32>
    tpu.vector_store %arg5[%c0_9, %c0_10, %c0_11], %23 {strides = array<i32>} : memref<1x16x128xf32, #tpu.memory_space<vmem>>, vector<1x16x128xf32>,
    return
  }
  func.func @transform_0(%arg0: i32) -> (i32, i32, i32) {
    %c0_i32 = arith.constant 0 : i32
    %c0_i32_0 = arith.constant 0 : i32
    %c0_i32_1 = arith.constant 0 : i32
    return %arg0, %c0_i32, %c0_i32_0 : i32, i32, i32
  }
  func.func @transform_1(%arg0: i32) -> (i32, i32) {
    %c0_i32 = arith.constant 0 : i32
    %c0_i32_0 = arith.constant 0 : i32
    %c0_i32_1 = arith.constant 0 : i32
    return %c0_i32, %c0_i32_0 : i32, i32
  }
  func.func @transform_2(%arg0: i32) -> (i32, i32) {
    %c0_i32 = arith.constant 0 : i32
    %c0_i32_0 = arith.constant 0 : i32
    %c0_i32_1 = arith.constant 0 : i32
    return %c0_i32, %c0_i32_0 : i32, i32
  }
  func.func @transform_3(%arg0: i32) -> (i32, i32) {
    %c0_i32 = arith.constant 0 : i32
    %c0_i32_0 = arith.constant 0 : i32
    %c0_i32_1 = arith.constant 0 : i32
    return %c0_i32, %c0_i32_0 : i32, i32
  }
  func.func @transform_4(%arg0: i32) -> (i32, i32, i32) {
    %c0_i32 = arith.constant 0 : i32
    %c0_i32_0 = arith.constant 0 : i32
    %c0_i32_1 = arith.constant 0 : i32
    return %arg0, %c0_i32, %c0_i32_0 : i32, i32, i32
  }
}

</mosaic_0001>

<bundles_post_ra>
// kernel: conv_module_forward.3
= control target key start
LH: loop header
LB: loop body
LE: loop exit
PB: predicated region body
PF: predicated region fallthrough
CT: control target
= control target key end

     0   :  { %9 = vsyncpa [#allocation3], 0  ;;  %s753_s0 = inlined_call_operand.vmem [shape: f32[2,16,128], index: 0, kind: input, shape index: {}]   ;;  %s754_s1 = inlined_call_operand.vmem [shape: f32[1,128], index: 1, kind: input, shape index: {}]   ;;  %s755_s2 = inlined_call_operand.vmem [shape: f32[1,128], index: 2, kind: input, shape index: {}]   ;;  %s756_s3 = inlined_call_operand.vmem [shape: bf16[128,128], index: 3, kind: input, shape index: {}]   ;;  %s757_s4 = inlined_call_operand.hbm [shape: f32[2,16,128], index: 4, kind: output, shape index: {}]  }
   0x1   :  { %11 = vsyncpa [#allocation3 + $0x1], 0  ;;  %s621_s15 = smov 0   ;;  %s623_s16 = smov 0  }
   0x2   :  { %s625_s17 = smov 0   ;;  %s627_s18 = smov 0  }
   0x3 LB: > { %s642_s19 = sadd.s32 4294967295, %s589_s18   ;;  %s415_s20 = sadd.s32 4294967294, %s589_s18   ;;  %s589_s18 = sphi %s627_s18, %s763_s18   ;;  %s585_s17 = sphi %s625_s17, %s762_s17   ;;  %s581_s16 = sphi %s623_s16, %s761_s16   ;;  %s577_s15 = sphi %s621_s15, %s760_s15  }
   0x4   : > { %s646_s21 = sadd.s32 1, %s589_s18   ;;  %s113_s22 = sadd.s32 1, %s585_s17 }
   0x5   : > { %s110_s23 = ssub.s32 %s589_s18, %s646_s21  ;;  %p123_p0 = scmp.ne.s32.totalorder %s585_s17, %s581_s16 }
   0x6   : > { %p111_p1 = scmp.eq.s32.totalorder %s110_s23, 0  ;;  %p124_p2 = scmp.eq.s32.totalorder %s642_s19, 1 }
   0x7   : > { %p129_p3 = scmp.ne.s32.totalorder %s581_s16, %s577_s15  ;;  %p130_p4 = scmp.eq.s32.totalorder %s415_s20, 1 }
   0x8   : > { %s657_s24 = scalar_select %p111_p1, %s585_s17, %s113_s22  }
   0x9   : > { %p659_p5 = por %p124_p2, %p123_p0  ;;  %p663_p6 = por %p130_p4, %p129_p3 }
   0xa   : > { %p418_p7 = scmp.ge.s32.totalorder %s589_s18, 1  ;;  %p165_p8 = scmp.lt.s32.totalorder %s589_s18, 3 }
   0xc   : > { %p166_p9 = pnand %p418_p7, %p165_p8 }
   0xd   : > { %p191_p10 = scmp.lt.s32.totalorder (!%p166_p9), %s642_s19, 1  ;;  %s188_s9 = sand.u32 (!%p166_p9), 1, %s581_s16  }
   0xe   : > { %169 = sbr.rel (%p166_p9) target bundleno = 277 (0x115), region = 36  ;;  %s419_s10 = sshll.u32 (!%p166_p9), %s188_s9, 4 }
   0xf   : > { %s440_s13 = sshll.u32 (!%p166_p9), %s642_s19, 8  ;;  %s713_s23 = scalar_lea.sflag (!%p166_p9), [#allocation3], %s188_s9 }
  0x10   : > { %s711_s22 = scalar_lea.hbm (!%p166_p9), %s757_s4, %s440_s13 }
  0x13   : > { %v513_v0 = vld [vmem:[%s756_s3 + $0x38] sm:$0xff]   ;;  %v591_v1 = vmov 0.0   ;;  %v514_v2 = vld [vmem:[%s756_s3 + $0x30] sm:$0xff]   ;;  %vm592_vm0 = vmmov 0   ;;  %s192_s5 = scalar_select %p191_p10, %s642_s19, 1  ;;  %v515_v3 = vld [vmem:[%s756_s3 + $0x28] sm:$0xff]  }
  0x14   : > { %450 = vmatprep.subr.bf16.mxu0 %v591_v1  ;;  %466 = vmatprep.mubr.msk.bf16.mxu0 %vm592_vm0, %v591_v1  ;;  %v422_v6 = vld [vmem:[%s754_s1] ss:$0 sm:$0xff]  ;;  %v517_v15 = vld [vmem:[%s756_s3 + $0x18] sm:$0xff]   ;;  %v518_v16 = vld [vmem:[%s756_s3 + $0x10] sm:$0xff]   ;;  %s593_s19 = smov [#allocation2]  }
  0x15   : > { %451 = vmatpush3.bf16.msra.mxu0 %v513_v0  ;;  %s439_s8 = sshll.u32 %s192_s5, 4  ;;  %v423_v9 = vld [vmem:[%s755_s2] ss:$0 sm:$0xff]  ;;  %v519_v17 = vld [vmem:[%s756_s3 + $0x8] sm:$0xff]   ;;  %s533_s28 = sshll.u32 %s593_s19, 4  ;;  %s534_s28 = int_to_ptr.vmem [resolvable:$false] %s533_s28 }
  0x16   : > { %452 = vmatprep.subr.bf16.mxu0 %v591_v1  ;;  %s195_s11 = scalar_lea.vmem %s753_s0, %s439_s8  ;;  %v516_v10 = vld [vmem:[%s756_s3 + $0x20] sm:$0xff]   ;;  %s535_s29 = scalar_lea.vmem %s534_s28, 512 }
  0x17   : > { %v197_v4 = vld [vmem:[%s195_s11] sm:$0xff]  ;;  %v198_v5 = vld [vmem:[%s195_s11 + $0x8] sm:$0xff]  ;;  %s190_s11 = scalar_lea.vmem [#allocation2], %s419_s10 }
  0x18   : > { %v206_v7 = vmul.f32 %v422_v6, %v197_v4  ;;  %v207_v8 = vmul.f32 %v422_v6, %v198_v5  ;;  %v520_v18 = vld [vmem:[%s756_s3] sm:$0xff]   ;;  %s353_s12 = sshll.u32 %s190_s11, 4  ;;  %s706_s12 = int_to_ptr.vmem [resolvable:$true] %s353_s12 }
  0x19   : > { %453 = vmatpush3.bf16.msra.mxu0 %v514_v2  ;;  %s529_s27 = scalar_lea.vmem %s706_s12, 256  ;;  %p536_p0 = scmp.lt.s32.totalorder %s706_s12, %s534_s28 }
  0x1a   : > { %454 = vmatprep.subr.bf16.mxu0 %v591_v1  ;;  %v215_v11 = vadd.f32 %v423_v9, %v206_v7  ;;  %v216_v12 = vadd.f32 %v423_v9, %v207_v8  ;;  %p530_p11 = scmp.ne.s32.totalorder %s706_s12, %s529_s27  ;;  %p537_p1 = scmp.lt.s32.totalorder %s535_s29, %s529_s27 }
  0x1c   : > { %v424_v13 = vmul.f32 -1.442695, %v215_v11  ;;  %v425_v14 = vmul.f32 -1.442695, %v216_v12  ;;  %p531_p12 = pnand %p530_p11, %p659_p5  ;;  %p538_p2 = por %p537_p1, %p536_p0 }
  0x1d   : > { %455 = vmatpush3.bf16.msra.mxu0 %v515_v3 }
  0x1e   : > { %456 = vmatprep.subr.bf16.mxu0 %v591_v1  ;;  %521 = vpow2.f32 %v424_v13  ;;  %p532_p13 = pneg %p531_p12 }
  0x1f   : > { %523 = vpow2.f32 %v425_v14 }
  0x20   : > { %p539_p3 = pnand %p538_p2, %p532_p13 }
  0x21   : > { %457 = vmatpush3.bf16.msra.mxu0 %v516_v10 }
  0x22   : > { %458 = vmatprep.subr.bf16.mxu0 %v591_v1 }
  0x25   : > { %459 = vmatpush3.bf16.msra.mxu0 %v517_v15 }
  0x26   : > { %460 = vmatprep.subr.bf16.mxu0 %v591_v1 }
  0x29   : > { %461 = vmatpush3.bf16.msra.mxu0 %v518_v16 }
  0x2a   : > { %462 = vmatprep.subr.bf16.mxu0 %v591_v1 }
  0x2b   : > { %v522_v19 = vpop.eup %521 }
  0x2c   : > { %v524_v20 = vpop.eup %523  ;;  %v223_v21 = vadd.f32 1.0, %v522_v19 }
  0x2d   : > { %463 = vmatpush3.bf16.msra.mxu0 %v519_v17  ;;  %v224_v22 = vadd.f32 1.0, %v524_v20 }
  0x2e   : > { %464 = vmatprep.subr.bf16.mxu0 %v591_v1  ;;  %525 = vrcp.f32 %v223_v21 }
  0x2f   : > { %527 = vrcp.f32 %v224_v22 }
  0x31   : > { %465 = vmatpush3.bf16.msra.mxu0 %v520_v18 }
  0x3b   : > { %v526_v23 = vpop.eup %525 }
  0x3c   : > { %v528_v24 = vpop.eup %527  ;;  %v229_v25 = vmul.f32 %v526_v23, %v215_v11 }
  0x3d   : > { %v230_v26 = vmul.f32 %v528_v24, %v216_v12 }
  0x3f   : > { %v231_v27 = vpack.c.bf16 %v230_v26, %v229_v25 }
  0x41   : > { %467 = vmatmul.mubr.bf16.vlgmr.msra.gmra.mxu0 %v231_v27 }
 0x101   : > { %v330_v28 = vpop.f32.mrf.mxu0 }
 0x102   : > { %337 = vst [vmem:[%s190_s11] sm:$0xff] %v330_v28 }
 0x103   : > { %v468_v29 = vpop.f32.mrf.mxu0 }
 0x105   : > { %v333_v30 = vpop.f32.mrf.mxu0 }
 0x106   : > { %338 = vst [vmem:[%s190_s11 + $0x8] sm:$0xff] %v333_v30 }
 0x107   : > { %v469_v31 = vpop.f32.mrf.mxu0 }
 0x108   : > { %542 = shalt.err (!%p539_p3)
}
 0x109   : > { %s543_s30 = scalar_lea.hbm %s711_s22, 256  ;;  %s547_s7 = scalar_lea.hbm %s757_s4, 512 }
 0x10a   : > { %p544_p4 = scmp.ne.s32.totalorder %s711_s22, %s543_s30  ;;  %p548_p9 = scmp.lt.s32.totalorder %s711_s22, %s757_s4 }
 0x10b   : > { %p549_p10 = scmp.lt.s32.totalorder %s547_s7, %s543_s30 }
 0x10c   : > { %p545_p7 = pnand %p544_p4, %p659_p5 }
 0x10d   : > { %p550_p11 = por %p549_p10, %p548_p9 }
 0x10e   : > { %p546_p8 = pneg %p545_p7 }
 0x110   : > { %p551_p12 = pnand %p550_p11, %p546_p8 }
 0x112   : > { %554 = shalt.err (!%p551_p12)
}
 0x113   : > { %s594_s10 = smov 128   ;;  %s595_s11 = smov 8  }
 0x114   : > { %470 = dma.vmem_to_hbm [thread:$0]  (%p659_p5), %s706_s12, 256, %s711_s22, %s713_s23, %s594_s10, %s594_s10, %s595_s11  }
 0x115 PF: > { %p476_p13 = scmp.ge.s32.totalorder %s589_s18, 2  ;;  %s368_s13 = sand.u32 1, %s577_s15  }
 0x116   : > { %s369_s14 = scalar_lea.sflag [#allocation3], %s368_s13 }
 0x117   : > { %p473_p0 = pnand %p476_p13, %p663_p6 }
 0x119   : > { %p474_p1 = pneg %p473_p0 }
 0x11b   : > { %572 = dma.done.wait (%p474_p1), %s369_s14, 256  }
 0x11c   : > { %574 = vsyncadd (%p474_p1), %s369_s14, 4294967040  ;;  %p14_p2 = scmp.ge.s32.totalorder %s646_s21, 4   ;;  %s760_s15 = smov %s581_s16 }
 0x11d   : > { %s761_s16 = smov %s585_s17  ;;  %s762_s17 = smov %s657_s24 }
 0x11e   : > { %s763_s18 = smov %s646_s21  ;;  %16 = sbr.rel (!%p14_p2) target bundleno = 3 (0x3), region = 71 }
 0x123   :  { %374 = vsyncpa [#allocation3], 1 }
 0x124   :  { %376 = vsyncpa [#allocation3 + $0x1], 1 }

// kernel: conv_module_forward.2
= control target key start
LH: loop header
LB: loop body
LE: loop exit
PB: predicated region body
PF: predicated region fallthrough
CT: control target
= control target key end

     0   :  { %s1082_s27 = smov 0   ;;  %s1244_s0 = inlined_call_operand.vmem [shape: f32[2,16,128], index: 0, kind: input, shape index: {}]   ;;  %s1245_s1 = inlined_call_operand.vmem [shape: f32[1,128], index: 1, kind: input, shape index: {}]   ;;  %s1246_s2 = inlined_call_operand.vmem [shape: f32[1,128], index: 2, kind: input, shape index: {}]   ;;  %s1247_s3 = inlined_call_operand.vmem [shape: bf16[128,128], index: 3, kind: input, shape index: {}]   ;;  %s1248_s4 = inlined_call_operand.vmem [shape: bf16[128,128], index: 4, kind: input, shape index: {}]   ;;  %s1249_s5 = inlined_call_operand.vmem [shape: f32[7,128], index: 5, kind: input, shape index: {}]   ;;  %s1250_s6 = inlined_call_operand.vmem [shape: f32[2,16,128], index: 6, kind: output, shape index: {0}]   ;;  %s1251_s7 = inlined_call_operand.vmem [shape: f32[2,1,128], index: 7, kind: output, shape index: {1}]   ;;  %s1252_s8 = inlined_call_operand.vmem [shape: f32[2,1,128], index: 8, kind: output, shape index: {2}]  }
   0x1 LB: > { %s889_s28 = sadd.s32 4294967295, %s1033_s27   ;;  %p893_p0 = scmp.ge.s32.totalorder %s1033_s27, 1  ;;  %s1033_s27 = sphi %s1082_s27, %s19_s27  }
   0x2   : > { %p267_p1 = scmp.lt.s32.totalorder %s1033_s27, 3 }
   0x4   : > { %p268_p2 = pnand %p893_p0, %p267_p1 }
   0x5   : > { %p307_p3 = scmp.lt.s32.totalorder (!%p268_p2), %s889_s28, 1 }
   0x6   : > { %271 = sbr.rel (%p268_p2) target bundleno = 594 (0x252), region = 44 }
   0xb   : > { %s1254_s28 = smov (!%p307_p3, %s889_s28), 1  ;;  %v999_v2 = vld [vmem:[%s1247_s3 + $0x38] sm:$0xff]   ;;  %v1035_v4 = vmov 0.0   ;;  %v326_v5 = vlaneseq  ;;  %v1001_v17 = vld [vmem:[%s1247_s3 + $0x30] sm:$0xff]   ;;  %v1003_v19 = vld [vmem:[%s1247_s3 + $0x28] sm:$0xff]   ;;  %vm1036_vm1 = vmmov 0  }
   0xc   : > { %s929_s29 = sshll.u32 %s1254_s28, 4  ;;  %v1000_v3 = vld [vmem:[%s1248_s4 + $0x38] sm:$0xff]   ;;  %949 = vmatprep.subr.bf16.mxu0 %v1035_v4  ;;  %969 = vmatprep.subr.bf16.mxu1 %v1035_v4  ;;  %v1002_v18 = vld [vmem:[%s1248_s4 + $0x30] sm:$0xff]   ;;  %v1004_v20 = vld [vmem:[%s1248_s4 + $0x28] sm:$0xff]   ;;  %s319_s30 = scalar_lea.vmem %s1251_s7, %s1254_s28 }
   0xd   : > { %s311_s10 = scalar_lea.vmem %s1244_s0, %s929_s29  ;;  %950 = vmatpush3.bf16.msra.mxu0 %v999_v2  ;;  %970 = vmatpush3.bf16.msra.mxu1 %v1000_v3  ;;  %v327_v6 = vand.u32 127, %v326_v5  ;;  %v1005_v21 = vld [vmem:[%s1247_s3 + $0x20] sm:$0xff]   ;;  %v1007_v23 = vld [vmem:[%s1247_s3 + $0x18] sm:$0xff]   ;;  %v1009_v25 = vld [vmem:[%s1247_s3 + $0x10] sm:$0xff]   ;;  %v1154_v61 = vshrl.u32 %v326_v5, 7  ;;  %s316_s25 = scalar_lea.vmem %s1250_s6, %s929_s29 }
   0xe   : > { %v324_v0 = vld [vmem:[%s311_s10] sm:$0xff]  ;;  %v325_v1 = vld [vmem:[%s311_s10 + $0x8] sm:$0xff]  ;;  %951 = vmatprep.subr.bf16.mxu0 %v1035_v4  ;;  %971 = vmatprep.subr.bf16.mxu1 %v1035_v4  ;;  %v1008_v24 = vld [vmem:[%s1248_s4 + $0x18] sm:$0xff]   ;;  %s322_s11 = scalar_lea.vmem %s1252_s8, %s1254_s28 }
   0xf   : > { %329 = vadd.xlane.f32.xlu0 %v324_v0  ;;  %vm328_vm0 = vcmp.lt.s32.totalorder %v327_v6, 24  ;;  %v1006_v22 = vld [vmem:[%s1248_s4 + $0x20] sm:$0xff]   ;;  %965 = vmatprep.mubr.msk.bf16.mxu0 %vm1036_vm1, %v1035_v4  ;;  %v1010_v26 = vld [vmem:[%s1248_s4 + $0x10] sm:$0xff]   ;;  %v1011_v27 = vld [vmem:[%s1247_s3 + $0x8] sm:$0xff]   ;;  %v598_v63 = vadd.s32 8, %v1154_v61  ;;  %vm605_vm2 = vcmp.lt.s32.totalorder %v1154_v61, 3 }
  0x10   : > { %985 = vmatprep.mubr.msk.bf16.mxu1 %vm1036_vm1, %v1035_v4  ;;  %v1012_v28 = vld [vmem:[%s1248_s4 + $0x8] sm:$0xff]   ;;  %v1013_v29 = vld [vmem:[%s1247_s3] sm:$0xff]   ;;  %vm629_vm3 = vcmp.lt.s32.totalorder %v1154_v61, 2  ;;  %vm653_vm4 = vcmp.lt.s32.totalorder %v1154_v61, 1  ;;  %vm692_vm7 = vcmp.lt.s32.totalorder %v1154_v61, 7  ;;  %vm716_vm8 = vcmp.lt.s32.totalorder %v1154_v61, 6 }
  0x11   : > { %952 = vmatpush3.bf16.msra.mxu0 %v1001_v17  ;;  %972 = vmatpush3.bf16.msra.mxu1 %v1002_v18  ;;  %v1014_v30 = vld [vmem:[%s1248_s4] sm:$0xff]   ;;  %vm740_vm12 = vcmp.lt.s32.totalorder %v1154_v61, 5 }
  0x12   : > { %953 = vmatprep.subr.bf16.mxu0 %v1035_v4  ;;  %973 = vmatprep.subr.bf16.mxu1 %v1035_v4  ;;  %v898_v39 = vld [vmem:[%s1245_s1] ss:$0 sm:$0xff]  ;;  %v921_v18 = vld [vmem:[%s1249_s5 + $0x1] ss:$0 sm:$0xff] }
  0x13   : > { %331 = vadd.xlane.f32.xlu0 %v325_v1  ;;  %v899_v43 = vld [vmem:[%s1246_s2] ss:$0 sm:$0xff] }
  0x15   : > { %954 = vmatpush3.bf16.msra.mxu0 %v1003_v19  ;;  %974 = vmatpush3.bf16.msra.mxu1 %v1004_v20 }
  0x16   : > { %955 = vmatprep.subr.bf16.mxu0 %v1035_v4  ;;  %975 = vmatprep.subr.bf16.mxu1 %v1035_v4 }
  0x19   : > { %956 = vmatpush3.bf16.msra.mxu0 %v1005_v21  ;;  %976 = vmatpush3.bf16.msra.mxu1 %v1006_v22 }
  0x1a   : > { %957 = vmatprep.subr.bf16.mxu0 %v1035_v4  ;;  %977 = vmatprep.subr.bf16.mxu1 %v1035_v4 }
  0x1d   : > { %958 = vmatpush3.bf16.msra.mxu0 %v1007_v23  ;;  %978 = vmatpush3.bf16.msra.mxu1 %v1008_v24 }
  0x1e   : > { %959 = vmatprep.subr.bf16.mxu0 %v1035_v4  ;;  %979 = vmatprep.subr.bf16.mxu1 %v1035_v4 }
  0x21   : > { %960 = vmatpush3.bf16.msra.mxu0 %v1009_v25  ;;  %980 = vmatpush3.bf16.msra.mxu1 %v1010_v26 }
  0x22   : > { %961 = vmatprep.subr.bf16.mxu0 %v1035_v4  ;;  %981 = vmatprep.subr.bf16.mxu1 %v1035_v4 }
  0x25   : > { %962 = vmatpush3.bf16.msra.mxu0 %v1011_v27  ;;  %982 = vmatpush3.bf16.msra.mxu1 %v1012_v28  ;;  %v922_v28 = vld [vmem:[%s1249_s5 + $0x2] ss:$0 sm:$0xff] }
  0x26   : > { %963 = vmatprep.subr.bf16.mxu0 %v1035_v4  ;;  %983 = vmatprep.subr.bf16.mxu1 %v1035_v4 }
  0x29   : > { %964 = vmatpush3.bf16.msra.mxu0 %v1013_v29  ;;  %984 = vmatpush3.bf16.msra.mxu1 %v1014_v30 }
  0x98   : > { %v330_v7 = vpop.xlane.xlu0 %329 }
  0x99   : > { %v333_v8 = vmul.f32 0.041666668, %v330_v7 }
  0x9b   : > { %v335_v9 = vsub.f32 %v324_v0, %v333_v8  ;;  %v918_v0 = vadd.s32 4294967293, %v1154_v61 }
  0x9c   : > { %v332_v10 = vpop.xlane.xlu0 %331 }
  0x9d   : > { %v334_v11 = vmul.f32 0.041666668, %v332_v10  ;;  %v337_v12 = vsel %vm328_vm0, %v335_v9, 0.0  ;;  %v632_v3 = vadd.s32 1, %v918_v0  ;;  %v656_v4 = vadd.s32 2, %v918_v0 }
  0x9e   : > { %v339_v13 = vmul.f32 %v337_v12, %v337_v12  ;;  %vm610_vm5 = vcmp.ge.s32.totalorder %v918_v0, 0 }
  0x9f   : > { %v336_v14 = vsub.f32 %v325_v1, %v334_v11  ;;  %v919_v1 = vadd.s32 4294967293, %v598_v63  ;;  %vm634_vm6 = vcmp.ge.s32.totalorder %v632_v3, 0  ;;  %vm658_vm9 = vcmp.ge.s32.totalorder %v656_v4, 0  ;;  %v926_v63 = vld [vmem:[%s1249_s5 + $0x6] ss:$0 sm:$0xff] }
  0xa0   : > { %341 = vadd.xlane.f32.xlu1 %v339_v13 }
  0xa1   : > { %v338_v15 = vsel %vm328_vm0, %v336_v14, 0.0  ;;  %v696_v6 = vadd.s32 4, %v919_v1  ;;  %v720_v7 = vadd.s32 5, %v919_v1  ;;  %v1158_v8 = vadd.s32 6, %v919_v1  ;;  %v920_v14 = vld [vmem:[%s1249_s5] ss:$0 sm:$0xff] }
  0xa2   : > { %v340_v16 = vmul.f32 %v338_v15, %v338_v15 }
  0xa3   : > { %vm700_vm10 = vcmp.lt.s32.totalorder %v696_v6, 16  ;;  %vm724_vm11 = vcmp.lt.s32.totalorder %v720_v7, 16  ;;  %vm748_vm13 = vcmp.lt.s32.totalorder %v1158_v8, 16 }
  0xa4   : > { %343 = vadd.xlane.f32.xlu1 %v340_v16 }
 0x129   : > { %v342_v31 = vpop.xlane.xlu1 %341 }
 0x12a   : > { %v345_v32 = vmul.f32 0.041666668, %v342_v31 }
 0x12c   : > { %v347_v33 = vadd.f32 1e-05, %v345_v32 }
 0x12d   : > { %v344_v34 = vpop.xlane.xlu1 %343 }
 0x12e   : > { %1015 = vrsqrt.f32 %v347_v33  ;;  %v346_v35 = vmul.f32 0.041666668, %v344_v34 }
 0x130   : > { %v348_v36 = vadd.f32 1e-05, %v346_v35 }
 0x132   : > { %1017 = vrsqrt.f32 %v348_v36 }
 0x13b   : > { %v1016_v37 = vpop.eup %1015 }
 0x13c   : > { %v351_v38 = vmul.f32 %v1016_v37, %v337_v12  ;;  %v923_v37 = vld [vmem:[%s1249_s5 + $0x3] ss:$0 sm:$0xff] }
 0x13e   : > { %v360_v42 = vmul.f32 %v898_v39, %v351_v38 }
 0x13f   : > { %v1018_v40 = vpop.eup %1017 }
 0x140   : > { %v352_v41 = vmul.f32 %v1018_v40, %v338_v15  ;;  %v369_v45 = vadd.f32 %v899_v43, %v360_v42 }
 0x142   : > { %v361_v44 = vmul.f32 %v898_v39, %v352_v41 }
 0x144   : > { %v370_v46 = vadd.f32 %v899_v43, %v361_v44 }
 0x146   : > { %v371_v47 = vpack.c.bf16 %v370_v46, %v369_v45  ;;  %v924_v46 = vld [vmem:[%s1249_s5 + $0x4] ss:$0 sm:$0xff] }
 0x148   : > { %966 = vmatmul.mubr.bf16.vlgmr.msra.gmra.mxu0 %v371_v47  ;;  %986 = vmatmul.mubr.bf16.vlgmr.msra.gmra.mxu1 %v371_v47 }
 0x208   : > { %v470_v48 = vpop.f32.mrf.mxu0  ;;  %v575_v49 = vpop.f32.mrf.mxu1 }
 0x209   : > { %v916_v50 = vmul.f32 -1.442695, %v575_v49 }
 0x20a   : > { %v967_v51 = vpop.f32.mrf.mxu0  ;;  %v987_v52 = vpop.f32.mrf.mxu1 }
 0x20b   : > { %1019 = vpow2.f32 %v916_v50 }
 0x20c   : > { %v473_v53 = vpop.f32.mrf.mxu0  ;;  %v578_v54 = vpop.f32.mrf.mxu1 }
 0x20d   : > { %v917_v55 = vmul.f32 -1.442695, %v578_v54  ;;  %v925_v54 = vld [vmem:[%s1249_s5 + $0x5] ss:$0 sm:$0xff] }
 0x20e   : > { %v968_v56 = vpop.f32.mrf.mxu0  ;;  %v988_v57 = vpop.f32.mrf.mxu1 }
 0x20f   : > { %1021 = vpow2.f32 %v917_v55 }
 0x218   : > { %v1020_v58 = vpop.eup %1019 }
 0x219   : > { %v588_v59 = vadd.f32 1.0, %v1020_v58 }
 0x21b   : > { %1023 = vrcp.f32 %v588_v59 }
 0x21c   : > { %v1022_v60 = vpop.eup %1021 }
 0x21d   : > { %v589_v62 = vadd.f32 1.0, %v1022_v60 }
 0x21f   : > { %1025 = vrcp.f32 %v589_v62 }
 0x228   : > { %v1024_v2 = vpop.eup %1023 }
 0x229   : > { %v1160_v9 = vmul.f32 %v1024_v2, %v470_v48 }
 0x22b   : > { %v603_v11 = vrot.slane %v1160_v9, 5  ;;  %v627_v12 = vrot.slane %v1160_v9, 6  ;;  %v651_v13 = vrot.slane %v1160_v9, 7  ;;  %v690_v15 = vrot.slane %v1160_v9, 1 }
 0x22c   : > { %v1026_v5 = vpop.eup %1025  ;;  %v714_v20 = vrot.slane %v1160_v9, 2  ;;  %v738_v21 = vrot.slane %v1160_v9, 3  ;;  %v686_v51 = vmul.f32 %v923_v37, %v1160_v9 }
 0x22d   : > { %v595_v10 = vmul.f32 %v1026_v5, %v473_v53 }
 0x22f   : > { %v604_v16 = vrot.slane %v595_v10, 5  ;;  %v628_v17 = vrot.slane %v595_v10, 6  ;;  %v652_v19 = vrot.slane %v595_v10, 7  ;;  %v691_v22 = vrot.slane %v595_v10, 1 }
 0x230   : > { %v715_v23 = vrot.slane %v595_v10, 2  ;;  %v739_v41 = vrot.slane %v595_v10, 3  ;;  %v687_v44 = vmul.f32 %v923_v37, %v595_v10 }
 0x231   : > { %v606_v24 = vsel %vm605_vm2, %v603_v11, %v604_v16  ;;  %v607_v25 = vsel %vm605_vm2, %v604_v16, %v603_v11  ;;  %v630_v26 = vsel %vm629_vm3, %v627_v12, %v628_v17  ;;  %v631_v27 = vsel %vm629_vm3, %v628_v17, %v627_v12 }
 0x232   : > { %v616_v29 = vsel %vm610_vm5, %v607_v25, 0.0  ;;  %v624_v30 = vmul.f32 %v920_v14, %v606_v24  ;;  %v640_v31 = vsel %vm634_vm6, %v631_v27, 0.0  ;;  %v648_v32 = vmul.f32 %v921_v18, %v630_v26 }
 0x233   : > { %v623_v33 = vmul.f32 %v920_v14, %v616_v29  ;;  %v647_v34 = vmul.f32 %v921_v18, %v640_v31  ;;  %v654_v35 = vsel %vm653_vm4, %v651_v13, %v652_v19  ;;  %v655_v36 = vsel %vm653_vm4, %v652_v19, %v651_v13 }
 0x234   : > { %v650_v38 = vadd.f32 %v648_v32, %v624_v30  ;;  %v664_v39 = vsel %vm658_vm9, %v655_v36, 0.0  ;;  %v672_v40 = vmul.f32 %v922_v28, %v654_v35  ;;  %v694_v45 = vsel %vm692_vm7, %v691_v22, %v690_v15 }
 0x235   : > { %v649_v42 = vadd.f32 %v647_v34, %v623_v33  ;;  %v671_v43 = vmul.f32 %v922_v28, %v664_v39  ;;  %v693_v48 = vsel %vm692_vm7, %v690_v15, %v691_v22  ;;  %v704_v49 = vsel %vm700_vm10, %v694_v45, 0.0 }
 0x236   : > { %v674_v47 = vadd.f32 %v672_v40, %v650_v38  ;;  %v718_v50 = vsel %vm716_vm8, %v715_v23, %v714_v20  ;;  %v711_v56 = vmul.f32 %v924_v46, %v704_v49  ;;  %v717_v57 = vsel %vm716_vm8, %v714_v20, %v715_v23 }
 0x237   : > { %v673_v52 = vadd.f32 %v671_v43, %v649_v42  ;;  %v728_v53 = vsel %vm724_vm11, %v718_v50, 0.0  ;;  %v742_v58 = vsel %vm740_vm12, %v739_v41, %v738_v21  ;;  %v710_v60 = vmul.f32 %v924_v46, %v693_v48 }
 0x238   : > { %v689_v55 = vadd.f32 %v687_v44, %v674_v47  ;;  %v752_v62 = vsel %vm748_vm13, %v742_v58, 0.0  ;;  %v735_v1 = vmul.f32 %v925_v54, %v728_v53  ;;  %v741_v2 = vsel %vm740_vm12, %v738_v21, %v739_v41 }
 0x239   : > { %v688_v59 = vadd.f32 %v686_v51, %v673_v52  ;;  %v734_v4 = vmul.f32 %v925_v54, %v717_v57  ;;  %v759_v7 = vmul.f32 %v926_v63, %v752_v62  ;;  %v758_v9 = vmul.f32 %v926_v63, %v741_v2 }
 0x23a   : > { %v713_v0 = vadd.f32 %v711_v56, %v689_v55 }
 0x23b   : > { %v712_v3 = vadd.f32 %v710_v60, %v688_v59 }
 0x23c   : > { %v737_v6 = vadd.f32 %v735_v1, %v713_v0 }
 0x23d   : > { %v736_v8 = vadd.f32 %v734_v4, %v712_v3 }
 0x23e   : > { %v761_v5 = vadd.f32 %v759_v7, %v737_v6 }
 0x23f   : > { %v760_v10 = vadd.f32 %v758_v9, %v736_v8 }
 0x240   : > { %763 = vst [vmem:[%s316_s25 + $0x8] sm:$0xff] %v761_v5  ;;  %v775_v11 = vmul.f32 %v761_v5, %v761_v5 }
 0x241   : > { %762 = vst [vmem:[%s316_s25] sm:$0xff] %v760_v10  ;;  %v766_v61 = vadd.f32 %v761_v5, %v760_v10  ;;  %v774_v12 = vmul.f32 %v760_v10, %v760_v10 }
 0x243   : > { %v767_v13 = vrot.slane %v766_v61, 4  ;;  %v776_v14 = vadd.f32 %v775_v11, %v774_v12 }
 0x245   : > { %v768_v15 = vadd.f32 %v767_v13, %v766_v61  ;;  %v777_v16 = vrot.slane %v776_v14, 4 }
 0x247   : > { %v769_v17 = vrot.slane %v768_v15, 2  ;;  %v778_v18 = vadd.f32 %v777_v16, %v776_v14 }
 0x249   : > { %v770_v19 = vadd.f32 %v769_v17, %v768_v15  ;;  %v779_v20 = vrot.slane %v778_v18, 2 }
 0x24b   : > { %v771_v21 = vrot.slane %v770_v19, 1  ;;  %v780_v22 = vadd.f32 %v779_v20, %v778_v18 }
 0x24d   : > { %v772_v23 = vadd.f32 %v771_v21, %v770_v19  ;;  %v781_v24 = vrot.slane %v780_v22, 1 }
 0x24f   : > { %773 = vst [vmem:[%s319_s30] sm:$0x1] %v772_v23  ;;  %v782_v25 = vadd.f32 %v781_v24, %v780_v22 }
 0x251   : > { %783 = vst [vmem:[%s322_s11] sm:$0x1] %v782_v25 }
 0x252 PF: > { %s19_s27 = sadd.s32 1, %s1033_s27  }
 0x253   : > { %p16_p4 = scmp.ge.s32.totalorder %s19_s27, 4  }
 0x255   :  { %18 = sbr.rel (!%p16_p4) target bundleno = 1 (0x1), region = 98 }

</bundles_post_ra>
